<compile_context>
chip_gen: v6e
topology: v6e:2x2x1
jax: 0.10.0
libtpu: 0.0.40
codegen_flags: <defaults>
</compile_context>

<pallas_src>
import math

import jax
import jax.numpy as jnp
from jax.experimental import pallas as pl
from jax.experimental.pallas import tpu as pltpu


def _shuffle_plug_kernel(x_ref, lcomb_ref, w1blk_ref, wcat2blk_ref,
                         zconst_ref, k3_ref, ybias_ref, o_ref):
    B, S, CS = x_ref.shape            # batch block, spatial rows, C*S lanes
    Sp, CSp = zconst_ref.shape        # S + 2*pad, C*(S + 2*pad)
    K = k3_ref.shape[0]               # kernel_size
    f32 = jnp.float32
    mm = w1blk_ref.dtype              # matmul operand dtype (f32; bf16 on v6e/v7x)

    x = x_ref[...].astype(f32)                                  # (B, S, CS)
    xf = x.reshape(B * S, CS).astype(mm)

    # ---- Stage 1: lane contractions of both branches as flat MXU matmuls
    # (M = B*S; bn1/bn2 scales pre-folded into the block-diagonal weights):
    #   t1 = s1 * (x @ W1^T)          (conv1 over H)
    #   r2 = s2 * (x @ [I | Wp2^T])   (pad_conv2 over H; commutes with conv2)
    t1 = jnp.dot(xf, w1blk_ref[...], preferred_element_type=f32)     # (B*S, CSp)
    r2 = jnp.dot(xf, wcat2blk_ref[...], preferred_element_type=f32)  # (B*S, CSp)
    tcat = jnp.concatenate([t1.reshape(B, S, CSp),
                            r2.reshape(B, S, CSp)], axis=1)          # (B, 2S, CSp)

    # ---- Stage 2: row (sublane) contraction of both branches in ONE matmul
    # batched over B only (channels already live on lanes):
    #   z = [I;Wp1] @ t1 + W2 @ r2 + const  ==  Lcomb @ [t1 ; r2] + Zconst
    lcomb = jnp.broadcast_to(lcomb_ref[...][None], (B, Sp, 2 * S))    # tiny (Sp,2S)
    z = jnp.einsum('brw,bwt->brt', lcomb, tcat.astype(mm),
                   preferred_element_type=f32)                        # (B, Sp, CSp)
    z = z + zconst_ref[...][None]

    # ---- conv3 (+ folded bn3 scale): depthwise KxK valid conv as K row-tap
    # MXU matmuls against banded block-diagonal tap matrices; f32 accumulation,
    # accumulator initialized from the first tap.
    acc = jnp.dot(z[:, 0:S, :].reshape(B * S, CSp).astype(k3_ref.dtype),
                  k3_ref[0], preferred_element_type=f32)
    for a in range(1, K):
        acc = acc + jnp.dot(z[:, a:a + S, :].reshape(B * S, CSp).astype(k3_ref.dtype),
                            k3_ref[a], preferred_element_type=f32)

    # ---- Epilogue: conv3 bias + bn3 shift (folded), identity shortcut, GELU.
    y = acc.reshape(B, S, CS) + ybias_ref[...] + x
    # TODO(synk): PyTorch F.gelu defaults to the exact erf GELU; erf has no
    # Pallas-TPU lowering, so the tanh form (max abs diff ~1e-3) is used here.
    c0 = jnp.float32(0.7978845608028654)
    g = 0.5 * y * (1.0 + jnp.tanh(c0 * (y + 0.044715 * y * y * y)))
    o_ref[...] = g.astype(o_ref.dtype)


def _pick_batch_block(n, max_b=8):
    """Largest divisor of n that is <= max_b while keeping grid length >= 2."""
    if n <= 1:
        return max(n, 1)
    best = 1
    for b in range(1, min(n, max_b) + 1):
        if n % b == 0 and n // b >= 2:
            best = b
    return best


def _block_diag(blocks):
    """blocks: (C, a, b) -> block-diagonal (C*a, C*b)."""
    C, a, b = blocks.shape
    out = jnp.zeros((C * a, C * b), blocks.dtype)
    for c in range(C):
        out = out.at[c * a:(c + 1) * a, c * b:(c + 1) * b].set(blocks[c])
    return out


def shuffle_plug_padding3_forward(x, params, *, kernel_size=9, eps=1e-5,
                                  matmul_dtype=jnp.float32):
    """x: (N, bn_ch, S, S) with S == in_ch1 == out_ch1.  params: module weights."""
    N, C, S, S2 = x.shape
    assert S == S2, "module requires H == W == in_ch1 == out_ch1"
    K = kernel_size
    pad = K // 2
    P, Sp = 2 * pad, S + 2 * pad
    CS, CSp = C * S, C * Sp
    f32 = jnp.float32

    w1 = params['conv1_w'].reshape(Sp, S).astype(f32)
    b1 = params['conv1_b'].astype(f32)
    wp1 = params['pad_conv1_w'].reshape(P, S).astype(f32)
    bp1 = params['pad_conv1_b'].astype(f32)
    w2 = params['conv2_w'].reshape(Sp, S).astype(f32)
    b2 = params['conv2_b'].astype(f32)
    wp2 = params['pad_conv2_w'].reshape(P, S).astype(f32)
    bp2 = params['pad_conv2_b'].astype(f32)
    k3 = params['conv3_w'].reshape(C, K, K).astype(f32)
    b3 = params['conv3_b'].astype(f32)

    def bn_fold(name):
        g, b, m, v = (params[f'{name}_{k}'].astype(f32) for k in ('g', 'b', 'm', 'v'))
        s = g / jnp.sqrt(v + eps)
        return s, b - m * s

    s1, t1 = bn_fold('bn1')
    s2, t2 = bn_fold('bn2')
    s3, t3 = bn_fold('bn3')

    eye = jnp.eye(S, dtype=f32)
    wcat1 = jnp.concatenate([eye, wp1], axis=0)          # (Sp, S): [out1 ; wp1@out1] rows
    wcat2 = jnp.concatenate([eye, wp2.T], axis=1)        # (S, Sp): [out2 , out2@wp2^T] cols
    bcat1 = jnp.concatenate([jnp.zeros((S,), f32), bp1])
    bcat2 = jnp.concatenate([jnp.zeros((S,), f32), bp2])

    # Channel-on-lanes block-diagonal right matrices (bn scales folded in).
    w1blk = _block_diag(s1[:, None, None] * jnp.broadcast_to(w1.T[None], (C, S, Sp)))
    wcat2blk = _block_diag(s2[:, None, None] * jnp.broadcast_to(wcat2[None], (C, S, Sp)))
    # Combined left matrix for the single batched row contraction.
    lcomb = jnp.concatenate([wcat1, w2], axis=1)         # (Sp, 2S)

    # All bias / BN-shift terms of both branches folded into one (Sp, C*Sp) constant.
    rs1 = wcat1.sum(axis=1)                              # (Sp,)
    cs2 = wcat2.sum(axis=0)                              # (Sp,)
    z1c = (s1[:, None, None] * (rs1[None, :, None] * b1[None, None, :]
                                + bcat1[None, :, None]) + t1[:, None, None])
    z2c = (s2[:, None, None] * (b2[None, :, None] * cs2[None, None, :]
                                + bcat2[None, None, :]) + t2[:, None, None])
    zconst = jnp.transpose(z1c + z2c, (1, 0, 2)).reshape(Sp, CSp)

    # conv3 taps as K banded block-diagonal matrices (bn3 scale folded in):
    #   K3[a][(c, m), (c, j)] = s3[c] * k3[c, a, m - j]   for 0 <= m - j < K.
    m_idx = jnp.arange(Sp)[:, None]
    j_idx = jnp.arange(S)[None, :]
    d = m_idx - j_idx
    valid = (d >= 0) & (d < K)
    taps = jnp.where(valid[None, None], k3[:, :, jnp.clip(d, 0, K - 1)], 0.0)
    taps = taps * s3[:, None, None, None]                # (C, K, Sp, S)
    k3mat = jnp.stack([_block_diag(taps[:, a]) for a in range(K)])   # (K, CSp, CS)

    # conv3 bias + bn3 shift as a per-channel lane vector.
    ybias = jnp.repeat(s3 * b3 + t3, S).reshape(1, CS)

    # Channel-on-lanes input slab: xL[n, w, c*S + h] = x[n, c, w, h].
    xl = jnp.transpose(x, (0, 2, 1, 3)).reshape(N, S, CS)

    B = _pick_batch_block(N)
    mm = matmul_dtype
    weights = (lcomb.astype(mm), w1blk.astype(mm), wcat2blk.astype(mm),
               zconst, k3mat.astype(mm), ybias)

    def _const_spec(arr):
        nd = arr.ndim
        return pl.BlockSpec(arr.shape, lambda n, _nd=nd: (0,) * _nd)

    in_specs = [pl.BlockSpec((B, S, CS), lambda n: (n, 0, 0))]
    in_specs += [_const_spec(w) for w in weights]

    out_l = pl.pallas_call(
        _shuffle_plug_kernel,
        out_shape=jax.ShapeDtypeStruct((N, S, CS), x.dtype),
        grid=(N // B,),
        in_specs=in_specs,
        out_specs=pl.BlockSpec((B, S, CS), lambda n: (n, 0, 0)),
        compiler_params=pltpu.CompilerParams(
            dimension_semantics=("parallel",)),
    )(xl, *weights)

    return out_l.reshape(N, S, C, S).transpose(0, 2, 1, 3)


def _reference(x, params, *, kernel_size=9, eps=1e-5):
    """Plain-JAX reference for the shuffle_plug_padding3 forward pass."""
    N, C, S, _ = x.shape
    pad = kernel_size // 2
    P, Sp = 2 * pad, S + 2 * pad
    w1 = params['conv1_w'].reshape(Sp, S); b1 = params['conv1_b']
    wp1 = params['pad_conv1_w'].reshape(P, S); bp1 = params['pad_conv1_b']
    w2 = params['conv2_w'].reshape(Sp, S); b2 = params['conv2_b']
    wp2 = params['pad_conv2_w'].reshape(P, S); bp2 = params['pad_conv2_b']

    def bn(t, name):
        g, b, m, v = (params[f'{name}_{k}'] for k in ('g', 'b', 'm', 'v'))
        sc = g / jnp.sqrt(v + eps)
        return t * sc[None, :, None, None] + (b - m * sc)[None, :, None, None]

    out1 = jnp.einsum('ncwh,oh->ncwo', x, w1) + b1[None, None, None, :]
    pad1 = jnp.einsum('pw,ncwo->ncpo', wp1, out1) + bp1[None, None, :, None]
    z1 = bn(jnp.concatenate([out1, pad1], axis=2), 'bn1')

    out2 = jnp.einsum('vw,ncwh->ncvh', w2, x) + b2[None, None, :, None]
    pad2 = jnp.einsum('ncvh,qh->ncvq', out2, wp2) + bp2[None, None, None, :]
    z2 = bn(jnp.concatenate([out2, pad2], axis=3), 'bn2')

    z = z1 + z2
    y3 = jax.lax.conv_general_dilated(
        z, params['conv3_w'], window_strides=(1, 1), padding='VALID',
        dimension_numbers=('NCHW', 'OIHW', 'NCHW'), feature_group_count=C)
    y3 = y3 + params['conv3_b'][None, :, None, None]
    y = bn(y3, 'bn3') + x
    c0 = 0.7978845608028654
    return 0.5 * y * (1.0 + jnp.tanh(c0 * (y + 0.044715 * y ** 3)))


if __name__ == "__main__":
    N, bn_ch, kernel_size = 2, 4, 9
    S = 16                         # in_ch1 == out_ch1 == H == W (module shape constraint)
    pad = kernel_size // 2
    P, Sp = 2 * pad, S + 2 * pad

    key = jax.random.PRNGKey(0)
    ks = jax.random.split(key, 24)

    def u(k, shape, bound):
        return jax.random.uniform(k, shape, jnp.float32, -bound, bound)

    bw = 1.0 / math.sqrt(S)           # kaiming_uniform(a=sqrt(5)) bound, fan_in = in_ch1
    bd = 1.0 / float(kernel_size)     # depthwise conv bound, fan_in = k*k
    params = {
        'conv1_w': u(ks[0], (Sp, S, 1, 1), bw), 'conv1_b': u(ks[1], (Sp,), bw),
        'pad_conv1_w': u(ks[2], (P, S, 1, 1), bw), 'pad_conv1_b': u(ks[3], (P,), bw),
        'conv2_w': u(ks[4], (Sp, S, 1, 1), bw), 'conv2_b': u(ks[5], (Sp,), bw),
        'pad_conv2_w': u(ks[6], (P, S, 1, 1), bw), 'pad_conv2_b': u(ks[7], (P,), bw),
        'conv3_w': u(ks[8], (bn_ch, 1, kernel_size, kernel_size), bd),
        'conv3_b': u(ks[9], (bn_ch,), bd),
    }
    for i, name in enumerate(('bn1', 'bn2', 'bn3')):
        params[f'{name}_g'] = 1.0 + 0.1 * jax.random.normal(ks[10 + 4 * i], (bn_ch,))
        params[f'{name}_b'] = 0.1 * jax.random.normal(ks[11 + 4 * i], (bn_ch,))
        params[f'{name}_m'] = 0.1 * jax.random.normal(ks[12 + 4 * i], (bn_ch,))
        params[f'{name}_v'] = jax.random.uniform(ks[13 + 4 * i], (bn_ch,), jnp.float32, 0.5, 1.5)

    x = jax.random.normal(ks[22], (N, bn_ch, S, S), jnp.float32)

    y = shuffle_plug_padding3_forward(x, params, kernel_size=kernel_size)
    y = jax.block_until_ready(y)

    y_ref = _reference(x, params, kernel_size=kernel_size)
    assert y.shape == (N, bn_ch, S, S)
    err = float(jnp.max(jnp.abs(y - y_ref)))
    assert err < 2e-3, f"max abs error vs reference: {err}"
    print("KERNEL_OK")
</pallas_src>

<mosaic_0001>
module attributes {stable_mosaic.version = 11 : i64} {
  func.func @_shuffle_plug_kernel(%arg0: i32, %arg1: memref<1x16x64xf32, #tpu.memory_space<vmem>>, %arg2: memref<24x32xf32, #tpu.memory_space<vmem>>, %arg3: memref<64x96xf32, #tpu.memory_space<vmem>>, %arg4: memref<64x96xf32, #tpu.memory_space<vmem>>, %arg5: memref<24x96xf32, #tpu.memory_space<vmem>>, %arg6: memref<9x96x64xf32, #tpu.memory_space<vmem>>, %arg7: memref<1x64xf32, #tpu.memory_space<vmem>>, %arg8: memref<1x16x64xf32, #tpu.memory_space<vmem>>) attributes {dimension_semantics = [#tpu.dimension_semantics<parallel>], iteration_bounds = array<i64: 2>, scalar_prefetch = 0 : i64, scratch_operands = 0 : i64, tpu.core_type = #tpu.core_type<tc>, window_params = [{transform_indices = @transform_0, window_bounds = array<i64: 1, 16, 64>}, {pipeline_mode = #tpu.pipeline_mode<synchronous>, transform_indices = @transform_1, window_bounds = array<i64: 24, 32>}, {pipeline_mode = #tpu.pipeline_mode<synchronous>, transform_indices = @transform_2, window_bounds = array<i64: 64, 96>}, {pipeline_mode = #tpu.pipeline_mode<synchronous>, transform_indices = @transform_3, window_bounds = array<i64: 64, 96>}, {pipeline_mode = #tpu.pipeline_mode<synchronous>, transform_indices = @transform_4, window_bounds = array<i64: 24, 96>}, {pipeline_mode = #tpu.pipeline_mode<synchronous>, transform_indices = @transform_5, window_bounds = array<i64: 9, 96, 64>}, {pipeline_mode = #tpu.pipeline_mode<synchronous>, transform_indices = @transform_6, window_bounds = array<i64: 1, 64>}, {transform_indices = @transform_7, window_bounds = array<i64: 1, 16, 64>}]} {
    %c0 = arith.constant 0 : index
    %c0_0 = arith.constant 0 : index
    %c0_1 = arith.constant 0 : index
    %0 = vector.load %arg1[%c0, %c0_0, %c0_1] : memref<1x16x64xf32, #tpu.memory_space<vmem>>, vector<1x16x64xf32>
    %1 = vector.shape_cast %0 : vector<1x16x64xf32> to vector<16x64xf32>
    %c0_2 = arith.constant 0 : index
    %c0_3 = arith.constant 0 : index
    %2 = vector.load %arg3[%c0_2, %c0_3] : memref<64x96xf32, #tpu.memory_space<vmem>>, vector<64x96xf32>
    %cst = arith.constant dense<0.000000e+00> : vector<16x96xf32>
    %3 = tpu.matmul %1, %2, %cst {dimension_numbers = #tpu.dot_dimension_numbers<[1], [0], [0], [1], [0, 0, 1, 1], [], []>} : vector<16x64xf32>, vector<64x96xf32>, vector<16x96xf32> -> vector<16x96xf32>
    %c0_4 = arith.constant 0 : index
    %c0_5 = arith.constant 0 : index
    %4 = vector.load %arg4[%c0_4, %c0_5] : memref<64x96xf32, #tpu.memory_space<vmem>>, vector<64x96xf32>
    %cst_6 = arith.constant dense<0.000000e+00> : vector<16x96xf32>
    %5 = tpu.matmul %1, %4, %cst_6 {dimension_numbers = #tpu.dot_dimension_numbers<[1], [0], [0], [1], [0, 0, 1, 1], [], []>} : vector<16x64xf32>, vector<64x96xf32>, vector<16x96xf32> -> vector<16x96xf32>
    %6 = vector.shape_cast %3 : vector<16x96xf32> to vector<1x16x96xf32>
    %7 = vector.shape_cast %5 : vector<16x96xf32> to vector<1x16x96xf32>
    %8 = tpu.concatenate %6, %7 in 1 : vector<1x16x96xf32>, vector<1x16x96xf32> -> vector<1x32x96xf32>
    %c0_7 = arith.constant 0 : index
    %c0_8 = arith.constant 0 : index
    %9 = vector.load %arg2[%c0_7, %c0_8] : memref<24x32xf32, #tpu.memory_space<vmem>>, vector<24x32xf32>
    %10 = vector.shape_cast %9 : vector<24x32xf32> to vector<1x24x32xf32>
    "tpu.trace_start"() <{level = 10 : i32, message = "brw,bwt->brt"}> : () -> ()
    %cst_9 = arith.constant dense<0.000000e+00> : vector<1x24x96xf32>
    %11 = tpu.matmul %10, %8, %cst_9 {dimension_numbers = #tpu.dot_dimension_numbers<[2], [1], [1], [2], [0, 0, 0, 1, 1, 2], [0], [0]>} : vector<1x24x32xf32>, vector<1x32x96xf32>, vector<1x24x96xf32> -> vector<1x24x96xf32>
    "tpu.trace_stop"() : () -> ()
    %c0_10 = arith.constant 0 : index
    %c0_11 = arith.constant 0 : index
    %12 = vector.load %arg5[%c0_10, %c0_11] : memref<24x96xf32, #tpu.memory_space<vmem>>, vector<24x96xf32>
    %13 = vector.shape_cast %12 : vector<24x96xf32> to vector<1x24x96xf32>
    %14 = arith.addf %11, %13 : vector<1x24x96xf32>
    %15 = vector.extract_strided_slice %14 {offsets = [0, 0, 0], sizes = [1, 16, 96], strides = [1, 1, 1]} : vector<1x24x96xf32> to vector<1x16x96xf32>
    %16 = vector.shape_cast %15 : vector<1x16x96xf32> to vector<16x96xf32>
    %c0_12 = arith.constant 0 : index
    %c0_13 = arith.constant 0 : index
    %c0_14 = arith.constant 0 : index
    %17 = vector.load %arg6[%c0_12, %c0_13, %c0_14] : memref<9x96x64xf32, #tpu.memory_space<vmem>>, vector<1x96x64xf32>
    %18 = vector.shape_cast %17 : vector<1x96x64xf32> to vector<96x64xf32>
    %cst_15 = arith.constant dense<0.000000e+00> : vector<16x64xf32>
    %19 = tpu.matmul %16, %18, %cst_15 {dimension_numbers = #tpu.dot_dimension_numbers<[1], [0], [0], [1], [0, 0, 1, 1], [], []>} : vector<16x96xf32>, vector<96x64xf32>, vector<16x64xf32> -> vector<16x64xf32>
    %20 = vector.extract_strided_slice %14 {offsets = [0, 1, 0], sizes = [1, 16, 96], strides = [1, 1, 1]} : vector<1x24x96xf32> to vector<1x16x96xf32>
    %21 = vector.shape_cast %20 : vector<1x16x96xf32> to vector<16x96xf32>
    %c1 = arith.constant 1 : index
    %c0_16 = arith.constant 0 : index
    %c0_17 = arith.constant 0 : index
    %22 = vector.load %arg6[%c1, %c0_16, %c0_17] : memref<9x96x64xf32, #tpu.memory_space<vmem>>, vector<1x96x64xf32>
    %23 = vector.shape_cast %22 : vector<1x96x64xf32> to vector<96x64xf32>
    %cst_18 = arith.constant dense<0.000000e+00> : vector<16x64xf32>
    %24 = tpu.matmul %21, %23, %cst_18 {dimension_numbers = #tpu.dot_dimension_numbers<[1], [0], [0], [1], [0, 0, 1, 1], [], []>} : vector<16x96xf32>, vector<96x64xf32>, vector<16x64xf32> -> vector<16x64xf32>
    %25 = arith.addf %19, %24 : vector<16x64xf32>
    %26 = vector.extract_strided_slice %14 {offsets = [0, 2, 0], sizes = [1, 16, 96], strides = [1, 1, 1]} : vector<1x24x96xf32> to vector<1x16x96xf32>
    %27 = vector.shape_cast %26 : vector<1x16x96xf32> to vector<16x96xf32>
    %c2 = arith.constant 2 : index
    %c0_19 = arith.constant 0 : index
    %c0_20 = arith.constant 0 : index
    %28 = vector.load %arg6[%c2, %c0_19, %c0_20] : memref<9x96x64xf32, #tpu.memory_space<vmem>>, vector<1x96x64xf32>
    %29 = vector.shape_cast %28 : vector<1x96x64xf32> to vector<96x64xf32>
    %cst_21 = arith.constant dense<0.000000e+00> : vector<16x64xf32>
    %30 = tpu.matmul %27, %29, %cst_21 {dimension_numbers = #tpu.dot_dimension_numbers<[1], [0], [0], [1], [0, 0, 1, 1], [], []>} : vector<16x96xf32>, vector<96x64xf32>, vector<16x64xf32> -> vector<16x64xf32>
    %31 = arith.addf %25, %30 : vector<16x64xf32>
    %32 = vector.extract_strided_slice %14 {offsets = [0, 3, 0], sizes = [1, 16, 96], strides = [1, 1, 1]} : vector<1x24x96xf32> to vector<1x16x96xf32>
    %33 = vector.shape_cast %32 : vector<1x16x96xf32> to vector<16x96xf32>
    %c3 = arith.constant 3 : index
    %c0_22 = arith.constant 0 : index
    %c0_23 = arith.constant 0 : index
    %34 = vector.load %arg6[%c3, %c0_22, %c0_23] : memref<9x96x64xf32, #tpu.memory_space<vmem>>, vector<1x96x64xf32>
    %35 = vector.shape_cast %34 : vector<1x96x64xf32> to vector<96x64xf32>
    %cst_24 = arith.constant dense<0.000000e+00> : vector<16x64xf32>
    %36 = tpu.matmul %33, %35, %cst_24 {dimension_numbers = #tpu.dot_dimension_numbers<[1], [0], [0], [1], [0, 0, 1, 1], [], []>} : vector<16x96xf32>, vector<96x64xf32>, vector<16x64xf32> -> vector<16x64xf32>
    %37 = arith.addf %31, %36 : vector<16x64xf32>
    %38 = vector.extract_strided_slice %14 {offsets = [0, 4, 0], sizes = [1, 16, 96], strides = [1, 1, 1]} : vector<1x24x96xf32> to vector<1x16x96xf32>
    %39 = vector.shape_cast %38 : vector<1x16x96xf32> to vector<16x96xf32>
    %c4 = arith.constant 4 : index
    %c0_25 = arith.constant 0 : index
    %c0_26 = arith.constant 0 : index
    %40 = vector.load %arg6[%c4, %c0_25, %c0_26] : memref<9x96x64xf32, #tpu.memory_space<vmem>>, vector<1x96x64xf32>
    %41 = vector.shape_cast %40 : vector<1x96x64xf32> to vector<96x64xf32>
    %cst_27 = arith.constant dense<0.000000e+00> : vector<16x64xf32>
    %42 = tpu.matmul %39, %41, %cst_27 {dimension_numbers = #tpu.dot_dimension_numbers<[1], [0], [0], [1], [0, 0, 1, 1], [], []>} : vector<16x96xf32>, vector<96x64xf32>, vector<16x64xf32> -> vector<16x64xf32>
    %43 = arith.addf %37, %42 : vector<16x64xf32>
    %44 = vector.extract_strided_slice %14 {offsets = [0, 5, 0], sizes = [1, 16, 96], strides = [1, 1, 1]} : vector<1x24x96xf32> to vector<1x16x96xf32>
    %45 = vector.shape_cast %44 : vector<1x16x96xf32> to vector<16x96xf32>
    %c5 = arith.constant 5 : index
    %c0_28 = arith.constant 0 : index
    %c0_29 = arith.constant 0 : index
    %46 = vector.load %arg6[%c5, %c0_28, %c0_29] : memref<9x96x64xf32, #tpu.memory_space<vmem>>, vector<1x96x64xf32>
    %47 = vector.shape_cast %46 : vector<1x96x64xf32> to vector<96x64xf32>
    %cst_30 = arith.constant dense<0.000000e+00> : vector<16x64xf32>
    %48 = tpu.matmul %45, %47, %cst_30 {dimension_numbers = #tpu.dot_dimension_numbers<[1], [0], [0], [1], [0, 0, 1, 1], [], []>} : vector<16x96xf32>, vector<96x64xf32>, vector<16x64xf32> -> vector<16x64xf32>
    %49 = arith.addf %43, %48 : vector<16x64xf32>
    %50 = vector.extract_strided_slice %14 {offsets = [0, 6, 0], sizes = [1, 16, 96], strides = [1, 1, 1]} : vector<1x24x96xf32> to vector<1x16x96xf32>
    %51 = vector.shape_cast %50 : vector<1x16x96xf32> to vector<16x96xf32>
    %c6 = arith.constant 6 : index
    %c0_31 = arith.constant 0 : index
    %c0_32 = arith.constant 0 : index
    %52 = vector.load %arg6[%c6, %c0_31, %c0_32] : memref<9x96x64xf32, #tpu.memory_space<vmem>>, vector<1x96x64xf32>
    %53 = vector.shape_cast %52 : vector<1x96x64xf32> to vector<96x64xf32>
    %cst_33 = arith.constant dense<0.000000e+00> : vector<16x64xf32>
    %54 = tpu.matmul %51, %53, %cst_33 {dimension_numbers = #tpu.dot_dimension_numbers<[1], [0], [0], [1], [0, 0, 1, 1], [], []>} : vector<16x96xf32>, vector<96x64xf32>, vector<16x64xf32> -> vector<16x64xf32>
    %55 = arith.addf %49, %54 : vector<16x64xf32>
    %56 = vector.extract_strided_slice %14 {offsets = [0, 7, 0], sizes = [1, 16, 96], strides = [1, 1, 1]} : vector<1x24x96xf32> to vector<1x16x96xf32>
    %57 = vector.shape_cast %56 : vector<1x16x96xf32> to vector<16x96xf32>
    %c7 = arith.constant 7 : index
    %c0_34 = arith.constant 0 : index
    %c0_35 = arith.constant 0 : index
    %58 = vector.load %arg6[%c7, %c0_34, %c0_35] : memref<9x96x64xf32, #tpu.memory_space<vmem>>, vector<1x96x64xf32>
    %59 = vector.shape_cast %58 : vector<1x96x64xf32> to vector<96x64xf32>
    %cst_36 = arith.constant dense<0.000000e+00> : vector<16x64xf32>
    %60 = tpu.matmul %57, %59, %cst_36 {dimension_numbers = #tpu.dot_dimension_numbers<[1], [0], [0], [1], [0, 0, 1, 1], [], []>} : vector<16x96xf32>, vector<96x64xf32>, vector<16x64xf32> -> vector<16x64xf32>
    %61 = arith.addf %55, %60 : vector<16x64xf32>
    %62 = vector.extract_strided_slice %14 {offsets = [0, 8, 0], sizes = [1, 16, 96], strides = [1, 1, 1]} : vector<1x24x96xf32> to vector<1x16x96xf32>
    %63 = vector.shape_cast %62 : vector<1x16x96xf32> to vector<16x96xf32>
    %c8 = arith.constant 8 : index
    %c0_37 = arith.constant 0 : index
    %c0_38 = arith.constant 0 : index
    %64 = vector.load %arg6[%c8, %c0_37, %c0_38] : memref<9x96x64xf32, #tpu.memory_space<vmem>>, vector<1x96x64xf32>
    %65 = vector.shape_cast %64 : vector<1x96x64xf32> to vector<96x64xf32>
    %cst_39 = arith.constant dense<0.000000e+00> : vector<16x64xf32>
    %66 = tpu.matmul %63, %65, %cst_39 {dimension_numbers = #tpu.dot_dimension_numbers<[1], [0], [0], [1], [0, 0, 1, 1], [], []>} : vector<16x96xf32>, vector<96x64xf32>, vector<16x64xf32> -> vector<16x64xf32>
    %67 = arith.addf %61, %66 : vector<16x64xf32>
    %68 = vector.shape_cast %67 : vector<16x64xf32> to vector<1x16x64xf32>
    %c0_40 = arith.constant 0 : index
    %c0_41 = arith.constant 0 : index
    %69 = vector.load %arg7[%c0_40, %c0_41] : memref<1x64xf32, #tpu.memory_space<vmem>>, vector<1x64xf32>
    %70 = vector.shape_cast %69 : vector<1x64xf32> to vector<1x1x64xf32>
    %71 = vector.broadcast %70 : vector<1x1x64xf32> to vector<1x16x64xf32>
    %72 = arith.addf %68, %71 : vector<1x16x64xf32>
    %73 = arith.addf %72, %0 : vector<1x16x64xf32>
    %cst_42 = arith.constant 5.000000e-01 : f32
    %74 = vector.broadcast %cst_42 : f32 to vector<1x16x64xf32>
    %75 = arith.mulf %74, %73 : vector<1x16x64xf32>
    %cst_43 = arith.constant 4.471500e-02 : f32
    %76 = vector.broadcast %cst_43 : f32 to vector<1x16x64xf32>
    %77 = arith.mulf %76, %73 : vector<1x16x64xf32>
    %78 = arith.mulf %77, %73 : vector<1x16x64xf32>
    %79 = arith.mulf %78, %73 : vector<1x16x64xf32>
    %80 = arith.addf %73, %79 : vector<1x16x64xf32>
    %cst_44 = arith.constant 0.797884583 : f32
    %81 = vector.broadcast %cst_44 : f32 to vector<1x16x64xf32>
    %82 = arith.mulf %81, %80 : vector<1x16x64xf32>
    %83 = math.tanh %82 : vector<1x16x64xf32>
    %cst_45 = arith.constant 1.000000e+00 : f32
    %84 = vector.broadcast %cst_45 : f32 to vector<1x16x64xf32>
    %85 = arith.addf %84, %83 : vector<1x16x64xf32>
    %86 = arith.mulf %75, %85 : vector<1x16x64xf32>
    %c0_46 = arith.constant 0 : index
    %c0_47 = arith.constant 0 : index
    %c0_48 = arith.constant 0 : index
    %87 = vector.load %arg8[%c0_46, %c0_47, %c0_48] : memref<1x16x64xf32, #tpu.memory_space<vmem>>, vector<1x16x64xf32>
    tpu.vector_store %arg8[%c0_46, %c0_47, %c0_48], %86 {strides = array<i32>} : memref<1x16x64xf32, #tpu.memory_space<vmem>>, vector<1x16x64xf32>,
    return
  }
  func.func @transform_0(%arg0: i32) -> (i32, i32, i32) {
    %c0_i32 = arith.constant 0 : i32
    %c0_i32_0 = arith.constant 0 : i32
    %c0_i32_1 = arith.constant 0 : i32
    return %arg0, %c0_i32, %c0_i32_0 : i32, i32, i32
  }
  func.func @transform_1(%arg0: i32) -> (i32, i32) {
    %c0_i32 = arith.constant 0 : i32
    %c0_i32_0 = arith.constant 0 : i32
    %c0_i32_1 = arith.constant 0 : i32
    return %c0_i32, %c0_i32_0 : i32, i32
  }
  func.func @transform_2(%arg0: i32) -> (i32, i32) {
    %c0_i32 = arith.constant 0 : i32
    %c0_i32_0 = arith.constant 0 : i32
    %c0_i32_1 = arith.constant 0 : i32
    return %c0_i32, %c0_i32_0 : i32, i32
  }
  func.func @transform_3(%arg0: i32) -> (i32, i32) {
    %c0_i32 = arith.constant 0 : i32
    %c0_i32_0 = arith.constant 0 : i32
    %c0_i32_1 = arith.constant 0 : i32
    return %c0_i32, %c0_i32_0 : i32, i32
  }
  func.func @transform_4(%arg0: i32) -> (i32, i32) {
    %c0_i32 = arith.constant 0 : i32
    %c0_i32_0 = arith.constant 0 : i32
    %c0_i32_1 = arith.constant 0 : i32
    return %c0_i32, %c0_i32_0 : i32, i32
  }
  func.func @transform_5(%arg0: i32) -> (i32, i32, i32) {
    %c0_i32 = arith.constant 0 : i32
    %c0_i32_0 = arith.constant 0 : i32
    %c0_i32_1 = arith.constant 0 : i32
    %c0_i32_2 = arith.constant 0 : i32
    return %c0_i32, %c0_i32_0, %c0_i32_1 : i32, i32, i32
  }
  func.func @transform_6(%arg0: i32) -> (i32, i32) {
    %c0_i32 = arith.constant 0 : i32
    %c0_i32_0 = arith.constant 0 : i32
    %c0_i32_1 = arith.constant 0 : i32
    return %c0_i32, %c0_i32_0 : i32, i32
  }
  func.func @transform_7(%arg0: i32) -> (i32, i32, i32) {
    %c0_i32 = arith.constant 0 : i32
    %c0_i32_0 = arith.constant 0 : i32
    %c0_i32_1 = arith.constant 0 : i32
    return %arg0, %c0_i32, %c0_i32_0 : i32, i32, i32
  }
}

</mosaic_0001>

<bundles_post_ra>
// kernel: tpu_custom_call.1
= control target key start
LH: loop header
LB: loop body
LE: loop exit
PB: predicated region body
PF: predicated region fallthrough
CT: control target
= control target key end

     0   :  { %12 = vsyncpa [#allocation3], 0  ;;  %s2885_s0 = inlined_call_operand.vmem [shape: f32[2,16,64], index: 0, kind: input, shape index: {}]   ;;  %s2886_s1 = inlined_call_operand.vmem [shape: f32[24,32], index: 1, kind: input, shape index: {}]   ;;  %s2887_s2 = inlined_call_operand.vmem [shape: f32[64,96], index: 2, kind: input, shape index: {}]   ;;  %s2888_s3 = inlined_call_operand.vmem [shape: f32[64,96], index: 3, kind: input, shape index: {}]   ;;  %s2889_s4 = inlined_call_operand.vmem [shape: f32[24,96], index: 4, kind: input, shape index: {}]   ;;  %s2890_s5 = inlined_call_operand.vmem [shape: f32[9,96,64], index: 5, kind: input, shape index: {}]   ;;  %s2891_s6 = inlined_call_operand.vmem [shape: f32[1,64], index: 6, kind: input, shape index: {}]   ;;  %s2892_s7 = inlined_call_operand.hbm [shape: f32[2,16,64], index: 7, kind: output, shape index: {}]  }
   0x1   :  { %14 = vsyncpa [#allocation3 + $0x1], 0  ;;  %s2281_s24 = smov 0   ;;  %s2283_s25 = smov 0  }
   0x2   :  { %s2285_s26 = smov 0   ;;  %s2287_s27 = smov 0  }
   0x3 LB: > { %s2302_s28 = sadd.s32 4294967295, %s2234_s27   ;;  %s1540_s29 = sadd.s32 4294967294, %s2234_s27   ;;  %s2234_s27 = sphi %s2287_s27, %s2898_s27   ;;  %s2230_s26 = sphi %s2285_s26, %s2897_s26   ;;  %s2226_s25 = sphi %s2283_s25, %s2896_s25   ;;  %s2222_s24 = sphi %s2281_s24, %s2895_s24  }
   0x4   : > { %s2306_s30 = sadd.s32 1, %s2234_s27   ;;  %s179_s8 = sadd.s32 1, %s2230_s26 }
   0x5   : > { %s176_s9 = ssub.s32 %s2234_s27, %s2306_s30  ;;  %p189_p0 = scmp.ne.s32.totalorder %s2230_s26, %s2226_s25 }
   0x6   : > { %p177_p1 = scmp.eq.s32.totalorder %s176_s9, 0  ;;  %p190_p2 = scmp.eq.s32.totalorder %s2302_s28, 1 }
   0x7   : > { %p195_p3 = scmp.ne.s32.totalorder %s2226_s25, %s2222_s24  ;;  %p196_p4 = scmp.eq.s32.totalorder %s1540_s29, 1 }
   0x8   : > { %s2317_s10 = scalar_select %p177_p1, %s2230_s26, %s179_s8  }
   0x9   : > { %p2319_p5 = por %p190_p2, %p189_p0  ;;  %p2323_p6 = por %p196_p4, %p195_p3 }
   0xa   : > { %p1543_p7 = scmp.ge.s32.totalorder %s2234_s27, 1  ;;  %p240_p8 = scmp.lt.s32.totalorder %s2234_s27, 3 }
   0xc   : > { %p241_p9 = pnand %p1543_p7, %p240_p8 }
   0xd   : > { %p272_p10 = scmp.lt.s32.totalorder (!%p241_p9), %s2302_s28, 1  ;;  %s1675_s16 = sshll.u32 (!%p241_p9), %s2302_s28, 8 }
   0xe   : > { %244 = sbr.rel (%p241_p9) target bundleno = 785 (0x311), region = 48  ;;  %s2839_s21 = scalar_lea.hbm (!%p241_p9), %s2892_s7, %s1675_s16 }
   0xf   : > { %s2238_s23 = smov (!%p241_p9), [#allocation2]  }
  0x10   : > { %s2178_s29 = sshll.u32 (!%p241_p9), %s2238_s23, 4  ;;  %s2179_s29 = int_to_ptr.vmem [resolvable:$false] %s2178_s29 }
  0x11   : > { %s2180_s9 = scalar_lea.vmem (!%p241_p9), %s2179_s29, 512 }
  0x13   : > { %v376_v0 = vld [vmem:[%s2888_s3 + $0x38] sm:$0xff]  ;;  %v375_v2 = vld [vmem:[%s2888_s3 + $0x30] sm:$0xff]  ;;  %v374_v4 = vld [vmem:[%s2888_s3 + $0x28] sm:$0xff]  ;;  %s273_s8 = scalar_select %p272_p10, %s2302_s28, 1  ;;  %vm287_vm0 = vcmask 523264   ;;  %v2236_v18 = vmov 0.0  }
  0x14   : > { %v286_v1 = vld [vmem:[%s2887_s2 + $0x38] sm:$0xff]  ;;  %1848 = vmatprep.subr.mxu1 %v376_v0  ;;  %v285_v3 = vld [vmem:[%s2887_s2 + $0x30] sm:$0xff]  ;;  %v284_v5 = vld [vmem:[%s2887_s2 + $0x28] sm:$0xff]  ;;  %vm2237_vm1 = vmmov 0   ;;  %vm458_vm2 = vcmask 261120   ;;  %vm582_vm3 = vcmask 785408  }
  0x15   : > { %1829 = vmatprep.subr.mxu0 %v286_v1  ;;  %1849 = vmatpush3.msra.mxu1 %v376_v0  ;;  %v373_v6 = vld [vmem:[%s2888_s3 + $0x20] sm:$0xff]  ;;  %v372_v8 = vld [vmem:[%s2888_s3 + $0x18] sm:$0xff]  ;;  %s1674_s20 = sshll.u32 %s273_s8, 4  ;;  %v371_v10 = vld [vmem:[%s2888_s3 + $0x10] sm:$0xff]  ;;  %vm576_vm4 = vcmask 1046528   ;;  %vm854_vm5 = vcmask 1044480  }
  0x16   : > { %1830 = vmatpush3.msra.mxu0 %v286_v1  ;;  %1850 = vmatprep.subr.mxu1 %v375_v2  ;;  %v283_v7 = vld [vmem:[%s2887_s2 + $0x20] sm:$0xff]  ;;  %v282_v9 = vld [vmem:[%s2887_s2 + $0x18] sm:$0xff]  ;;  %v281_v11 = vld [vmem:[%s2887_s2 + $0x10] sm:$0xff]  ;;  %s276_s14 = scalar_lea.vmem %s2885_s0, %s1674_s20  ;;  %vm754_vm6 = vcmask 1045504   ;;  %vm1054_vm7 = vcmask 1042432   ;;  %vm954_vm8 = vcmask 1043456  }
  0x17   : > { %1831 = vmatprep.subr.mxu0 %v285_v3  ;;  %1851 = vmatpush3.msra.mxu1 %v375_v2  ;;  %v370_v12 = vld [vmem:[%s2888_s3 + $0x8] sm:$0xff]  ;;  %v369_v14 = vld [vmem:[%s2888_s3] sm:$0xff]  ;;  %v1565_v19 = vld [vmem:[%s2890_s5 + $0xb8] sm:$0xff]  ;;  %vm1254_vm9 = vcmask 1040384   ;;  %vm1154_vm10 = vcmask 1041408   ;;  %s269_s8 = sand.u32 1, %s2226_s25  }
  0x18   : > { %1832 = vmatpush3.msra.mxu0 %v285_v3  ;;  %1852 = vmatprep.subr.mxu1 %v374_v4  ;;  %v280_v13 = vld [vmem:[%s2887_s2 + $0x8] sm:$0xff]  ;;  %v2379_v15 = vld [vmem:[%s276_s14] sm:$0xff]  ;;  %v1564_v20 = vld [vmem:[%s2890_s5 + $0xb0] sm:$0xff]  ;;  %s1544_s15 = sshll.u32 %s269_s8, 4  ;;  %s2845_s28 = scalar_lea.sflag [#allocation3], %s269_s8 }
  0x19   : > { %1833 = vmatprep.subr.mxu0 %v284_v5  ;;  %1853 = vmatpush3.msra.mxu1 %v374_v4  ;;  %v279_v16 = vld [vmem:[%s2887_s2] sm:$0xff]  ;;  %v2384_v17 = vld [vmem:[%s276_s14 + $0x8] sm:$0xff]  ;;  %v1561_v23 = vld [vmem:[%s2890_s5 + $0x98] sm:$0xff]  ;;  %s271_s17 = scalar_lea.vmem [#allocation2], %s1544_s15 }
  0x1a   : > { %1834 = vmatpush3.msra.mxu0 %v284_v5  ;;  %1854 = vmatprep.subr.mxu1 %v373_v6  ;;  %v1563_v21 = vld [vmem:[%s2890_s5 + $0xa8] sm:$0xff]  ;;  %v1562_v22 = vld [vmem:[%s2890_s5 + $0xa0] sm:$0xff]  ;;  %v1560_v24 = vld [vmem:[%s2890_s5 + $0x90] sm:$0xff]  ;;  %s1478_s18 = sshll.u32 %s271_s17, 4  ;;  %s2841_s18 = int_to_ptr.vmem [resolvable:$true] %s1478_s18 }
  0x1b   : > { %1835 = vmatprep.subr.mxu0 %v283_v7  ;;  %1855 = vmatpush3.msra.mxu1 %v373_v6  ;;  %v452_v28 = vld [vmem:[%s2886_s1] sm:$0xff]  ;;  %v559_v29 = vld [vmem:[%s2890_s5 + $0x58] sm:$0xff]  ;;  %v558_v31 = vld [vmem:[%s2890_s5 + $0x50] sm:$0xff]  ;;  %s2174_s22 = scalar_lea.vmem %s2841_s18, 256  ;;  %p2181_p0 = scmp.lt.s32.totalorder %s2841_s18, %s2179_s29 }
  0x1c   : > { %1836 = vmatpush3.msra.mxu0 %v283_v7  ;;  %1856 = vmatprep.subr.mxu1 %v372_v8  ;;  %v453_v32 = vld [vmem:[%s2886_s1 + $0x8] sm:$0xff]  ;;  %v556_v34 = vld [vmem:[%s2890_s5 + $0x40] sm:$0xff]  ;;  %v454_v35 = vld [vmem:[%s2886_s1 + $0x10] sm:$0xff]  ;;  %p2175_p11 = scmp.ne.s32.totalorder %s2841_s18, %s2174_s22  ;;  %p2182_p1 = scmp.lt.s32.totalorder %s2180_s9, %s2174_s22 }
  0x1d   : > { %1837 = vmatprep.subr.mxu0 %v282_v9  ;;  %1857 = vmatpush3.msra.mxu1 %v372_v8  ;;  %v557_v33 = vld [vmem:[%s2890_s5 + $0x48] sm:$0xff]  ;;  %v555_v36 = vld [vmem:[%s2890_s5 + $0x38] sm:$0xff]  ;;  %v554_v37 = vld [vmem:[%s2890_s5 + $0x30] sm:$0xff] }
  0x1e   : > { %1838 = vmatpush3.msra.mxu0 %v282_v9  ;;  %1858 = vmatprep.subr.mxu1 %v371_v10  ;;  %v553_v38 = vld [vmem:[%s2890_s5 + $0x28] sm:$0xff]  ;;  %v552_v39 = vld [vmem:[%s2890_s5 + $0x20] sm:$0xff]  ;;  %v551_v40 = vld [vmem:[%s2890_s5 + $0x18] sm:$0xff]  ;;  %p2176_p12 = pnand %p2175_p11, %p2319_p5  ;;  %p2183_p2 = por %p2182_p1, %p2181_p0 }
  0x1f   : > { %1839 = vmatprep.subr.mxu0 %v281_v11  ;;  %1859 = vmatpush3.msra.mxu1 %v371_v10  ;;  %v550_v41 = vld [vmem:[%s2890_s5 + $0x10] sm:$0xff]  ;;  %v1559_v42 = vld [vmem:[%s2890_s5 + $0x88] sm:$0xff]  ;;  %v1558_v44 = vld [vmem:[%s2890_s5 + $0x80] sm:$0xff] }
  0x20   : > { %1840 = vmatpush3.msra.mxu0 %v281_v11  ;;  %1860 = vmatprep.subr.mxu1 %v370_v12  ;;  %v549_v43 = vld [vmem:[%s2890_s5 + $0x8] sm:$0xff]  ;;  %v548_v45 = vld [vmem:[%s2890_s5] sm:$0xff]  ;;  %v1557_v46 = vld [vmem:[%s2890_s5 + $0x78] sm:$0xff]  ;;  %p2177_p13 = pneg %p2176_p12 }
  0x21   : > { %1841 = vmatprep.subr.mxu0 %v280_v13  ;;  %1861 = vmatpush3.msra.mxu1 %v370_v12  ;;  %v1595_v47 = vld [vmem:[%s2890_s5 + $0x178] sm:$0xff]  ;;  %v1556_v48 = vld [vmem:[%s2890_s5 + $0x70] sm:$0xff]  ;;  %v1555_v49 = vld [vmem:[%s2890_s5 + $0x68] sm:$0xff] }
  0x22   : > { %1842 = vmatpush3.msra.mxu0 %v280_v13  ;;  %1862 = vmatprep.subr.mxu1 %v369_v14  ;;  %v1554_v50 = vld [vmem:[%s2890_s5 + $0x60] sm:$0xff]  ;;  %v1581_v51 = vld [vmem:[%s2890_s5 + $0x118] sm:$0xff]  ;;  %v456_v56 = vld [vmem:[%s2889_s4 + $0x8] sm:$0xff]  ;;  %p2184_p3 = pnand %p2183_p2, %p2177_p13 }
  0x23   : > { %1864 = vmatprep.mubr.msk.f32.mxu1 %vm287_vm0, %v2379_v15  ;;  %1863 = vmatpush3.msra.mxu1 %v369_v14  ;;  %v455_v52 = vld [vmem:[%s2889_s4] sm:$0xff]  ;;  %v457_v60 = vld [vmem:[%s2889_s4 + $0x10] sm:$0xff]  ;;  %v1593_v3 = vld [vmem:[%s2890_s5 + $0x168] sm:$0xff] }
  0x24   : > { %1843 = vmatprep.subr.mxu0 %v279_v16  ;;  %1865 = vmatmul.mubr.msk.f32.vlgmr.msra.gmra.mxu1 %vm287_vm0, %v2384_v17  ;;  %v1594_v61 = vld [vmem:[%s2890_s5 + $0x170] sm:$0xff]  ;;  %v1592_v8 = vld [vmem:[%s2890_s5 + $0x160] sm:$0xff]  ;;  %v1591_v11 = vld [vmem:[%s2890_s5 + $0x158] sm:$0xff] }
  0x25   : > { %1844 = vmatpush3.msra.mxu0 %v279_v16  ;;  %1845 = vmatprep.mubr.msk.f32.mxu0 %vm287_vm0, %v2379_v15  ;;  %v1580_v13 = vld [vmem:[%s2890_s5 + $0x110] sm:$0xff] }
  0x26   : > { %1846 = vmatmul.mubr.msk.f32.vlgmr.msra.gmra.mxu0 %vm287_vm0, %v2384_v17  ;;  %1867 = vmatprep.subr.mxu0 %v2236_v18 }
  0x27   : > { %1875 = vmatprep.mubr.msk.f32.mxu0 %vm2237_vm1, %v2236_v18  ;;  %1884 = vmatprep.subr.mxu1 %v1565_v19 }
  0x28   : > { %1885 = vmatpush3.msra.mxu1 %v1565_v19  ;;  %v1579_v19 = vld [vmem:[%s2890_s5 + $0x108] sm:$0xff] }
  0x29   : > { %1886 = vmatprep.subr.mxu1 %v1564_v20 }
  0x2a   : > { %1887 = vmatpush3.msra.mxu1 %v1564_v20  ;;  %v1589_v20 = vld [vmem:[%s2890_s5 + $0x148] sm:$0xff] }
  0x2b   : > { %1888 = vmatprep.subr.mxu1 %v1563_v21 }
  0x2c   : > { %1889 = vmatpush3.msra.mxu1 %v1563_v21  ;;  %v1578_v21 = vld [vmem:[%s2890_s5 + $0x100] sm:$0xff] }
  0x2d   : > { %1890 = vmatprep.subr.mxu1 %v1562_v22 }
  0x2e   : > { %1891 = vmatpush3.msra.mxu1 %v1562_v22  ;;  %v1588_v22 = vld [vmem:[%s2890_s5 + $0x140] sm:$0xff] }
  0x2f   : > { %1892 = vmatprep.subr.mxu1 %v1561_v23 }
  0x30   : > { %1893 = vmatpush3.msra.mxu1 %v1561_v23  ;;  %v1577_v23 = vld [vmem:[%s2890_s5 + $0xf8] sm:$0xff] }
  0x31   : > { %1894 = vmatprep.subr.mxu1 %v1560_v24 }
  0x32   : > { %1895 = vmatpush3.msra.mxu1 %v1560_v24  ;;  %v1587_v24 = vld [vmem:[%s2890_s5 + $0x138] sm:$0xff] }
  0x33   : > { %1896 = vmatprep.subr.mxu1 %v1559_v42 }
  0x34   : > { %1897 = vmatpush3.msra.mxu1 %v1559_v42  ;;  %v1570_v42 = vld [vmem:[%s2890_s5 + $0xc0] sm:$0xff] }
  0x35   : > { %1898 = vmatprep.subr.mxu1 %v1558_v44 }
  0x36   : > { %1899 = vmatpush3.msra.mxu1 %v1558_v44  ;;  %v1620_v44 = vld [vmem:[%s2890_s5 + $0x220] sm:$0xff] }
  0x37   : > { %1900 = vmatprep.subr.mxu1 %v1557_v46 }
  0x38   : > { %1901 = vmatpush3.msra.mxu1 %v1557_v46  ;;  %v1609_v46 = vld [vmem:[%s2890_s5 + $0x1d8] sm:$0xff] }
  0x39   : > { %1902 = vmatprep.subr.mxu1 %v1556_v48 }
  0x3a   : > { %1903 = vmatpush3.msra.mxu1 %v1556_v48 }
  0x3b   : > { %1904 = vmatprep.subr.mxu1 %v1555_v49 }
  0x3c   : > { %1905 = vmatpush3.msra.mxu1 %v1555_v49  ;;  %v1619_v49 = vld [vmem:[%s2890_s5 + $0x218] sm:$0xff] }
  0x3d   : > { %1906 = vmatprep.subr.mxu1 %v1554_v50 }
  0x3e   : > { %1907 = vmatpush3.msra.mxu1 %v1554_v50  ;;  %v1608_v50 = vld [vmem:[%s2890_s5 + $0x1d0] sm:$0xff] }
  0x3f   : > { %1938 = vmatprep.subr.mxu1 %v1581_v51 }
  0xe4   : > { %v1866_v25 = vpop.f32.mrf.mxu1 }
  0xe5   : > { %1868 = vmatpush3.msra.mxu0 %v1866_v25  ;;  %v1576_v25 = vld [vmem:[%s2890_s5 + $0xf0] sm:$0xff] }
  0xe6   : > { %v1847_v26 = vpop.f32.mrf.mxu0  ;;  %v443_v27 = vpop.f32.mrf.mxu1  ;;  %1869 = vmatprep.subr.mxu0 %v2236_v18 }
  0xe7   : > { %1870 = vmatpush3.msra.mxu0 %v443_v27  ;;  %v1575_v27 = vld [vmem:[%s2890_s5 + $0xe8] sm:$0xff] }
  0xe8   : > { %1871 = vmatprep.subr.mxu0 %v2236_v18  ;;  %v360_v30 = vpop.f32.mrf.mxu0 }
  0xe9   : > { %1872 = vmatpush3.msra.mxu0 %v1847_v26  ;;  %v1586_v26 = vld [vmem:[%s2890_s5 + $0x130] sm:$0xff] }
  0xea   : > { %1873 = vmatprep.subr.mxu0 %v2236_v18 }
  0xeb   : > { %1874 = vmatpush3.msra.mxu0 %v360_v30  ;;  %v1584_v30 = vld [vmem:[%s2890_s5 + $0x120] sm:$0xff] }
  0xec   : > { %1876 = vmatmul.mubr.msk.f32.vlgmr.msra.gmra.mxu0 %vm458_vm2, %v452_v28  ;;  %1911 = vmatprep.subr.mxu0 %v559_v29  ;;  %v1585_v28 = vld [vmem:[%s2890_s5 + $0x128] sm:$0xff] }
  0xed   : > { %1878 = vmatprep.mubr.msk.f32.mxu0 %vm2237_vm1, %v2236_v18  ;;  %1912 = vmatpush3.msra.mxu0 %v559_v29  ;;  %v1574_v29 = vld [vmem:[%s2890_s5 + $0xe0] sm:$0xff] }
  0xee   : > { %1913 = vmatprep.subr.mxu0 %v558_v31 }
  0xef   : > { %1914 = vmatpush3.msra.mxu0 %v558_v31  ;;  %v1573_v31 = vld [vmem:[%s2890_s5 + $0xd8] sm:$0xff] }
  0xf0   : > { %1879 = vmatmul.mubr.msk.f32.gmra.mxu0 %vm458_vm2, %v453_v32  ;;  %1915 = vmatprep.subr.mxu0 %v557_v33 }
  0xf1   : > { %1881 = vmatprep.mubr.msk.f32.mxu0 %vm2237_vm1, %v2236_v18  ;;  %1916 = vmatpush3.msra.mxu0 %v557_v33  ;;  %v1590_v18 = vld [vmem:[%s2890_s5 + $0x150] sm:$0xff]  ;;  %v1623_v33 = vld [vmem:[%s2890_s5 + $0x238] sm:$0xff] }
  0xf2   : > { %1917 = vmatprep.subr.mxu0 %v556_v34 }
  0xf3   : > { %1918 = vmatpush3.msra.mxu0 %v556_v34 }
  0xf4   : > { %1882 = vmatmul.mubr.msk.f32.gmra.mxu0 %vm458_vm2, %v454_v35  ;;  %1919 = vmatprep.subr.mxu0 %v555_v36  ;;  %v1572_v35 = vld [vmem:[%s2890_s5 + $0xd0] sm:$0xff] }
  0xf5   : > { %1920 = vmatpush3.msra.mxu0 %v555_v36 }
  0xf6   : > { %1921 = vmatprep.subr.mxu0 %v554_v37 }
  0xf7   : > { %1922 = vmatpush3.msra.mxu0 %v554_v37 }
  0xf8   : > { %1923 = vmatprep.subr.mxu0 %v553_v38 }
  0xf9   : > { %1924 = vmatpush3.msra.mxu0 %v553_v38  ;;  %v1622_v38 = vld [vmem:[%s2890_s5 + $0x230] sm:$0xff] }
  0xfa   : > { %1925 = vmatprep.subr.mxu0 %v552_v39 }
  0xfb   : > { %1926 = vmatpush3.msra.mxu0 %v552_v39  ;;  %v1571_v39 = vld [vmem:[%s2890_s5 + $0xc8] sm:$0xff] }
  0xfc   : > { %1927 = vmatprep.subr.mxu0 %v551_v40 }
  0xfd   : > { %1928 = vmatpush3.msra.mxu0 %v551_v40 }
  0xfe   : > { %1929 = vmatprep.subr.mxu0 %v550_v41 }
  0xff   : > { %1930 = vmatpush3.msra.mxu0 %v550_v41  ;;  %v1621_v41 = vld [vmem:[%s2890_s5 + $0x228] sm:$0xff] }
 0x100   : > { %1931 = vmatprep.subr.mxu0 %v549_v43 }
 0x101   : > { %1932 = vmatpush3.msra.mxu0 %v549_v43 }
 0x102   : > { %1933 = vmatprep.subr.mxu0 %v548_v45 }
 0x103   : > { %1934 = vmatpush3.msra.mxu0 %v548_v45 }
 0x104   : > { %1965 = vmatprep.subr.mxu0 %v1595_v47 }
 0x1ac   : > { %v534_v53 = vpop.f32.mrf.mxu0 }
 0x1ad   : > { %v2490_v54 = vadd.f32 %v534_v53, %v455_v52  ;;  %v1618_v52 = vld [vmem:[%s2890_s5 + $0x210] sm:$0xff]  ;;  %v1607_v53 = vld [vmem:[%s2890_s5 + $0x1c8] sm:$0xff] }
 0x1ae   : > { %v1877_v55 = vpop.f32.mrf.mxu0 }
 0x1af   : > { %1935 = vmatprep.mubr.msk.f32.mxu0 %vm582_vm3, %v2490_v54  ;;  %v577_v62 = vrot.slane %v2490_v54, 1  ;;  %v855_v0 = vrot.slane %v2490_v54, 3  ;;  %v755_v14 = vrot.slane %v2490_v54, 2  ;;  %v1055_v37 = vrot.slane %v2490_v54, 5  ;;  %v1617_v55 = vld [vmem:[%s2890_s5 + $0x208] sm:$0xff] }
 0x1b0   : > { %v539_v57 = vpop.f32.mrf.mxu0  ;;  %v955_v48 = vrot.slane %v2490_v54, 4 }
 0x1b1   : > { %v2497_v58 = vadd.f32 %v539_v57, %v456_v56  ;;  %v1606_v56 = vld [vmem:[%s2890_s5 + $0x1c0] sm:$0xff] }
 0x1b2   : > { %v1880_v59 = vpop.f32.mrf.mxu0  ;;  %v1616_v57 = vld [vmem:[%s2890_s5 + $0x200] sm:$0xff] }
 0x1b3   : > { %1936 = vmatmul.mubr.msk.f32.vlgmr.msra.gmra.mxu0 %vm582_vm3, %v2497_v58  ;;  %v578_v63 = vrot.slane %v2497_v58, 1  ;;  %v856_v1 = vrot.slane %v2497_v58, 3  ;;  %v756_v10 = vrot.slane %v2497_v58, 2  ;;  %v1056_v34 = vrot.slane %v2497_v58, 5  ;;  %v1605_v59 = vld [vmem:[%s2890_s5 + $0x1b8] sm:$0xff] }
 0x1b4   : > { %1966 = vmatpush3.msra.mxu0 %v1595_v47  ;;  %v544_v2 = vpop.f32.mrf.mxu0  ;;  %v956_v45 = vrot.slane %v2497_v58, 4 }
 0x1b5   : > { %v2514_v4 = vadd.f32 %v544_v2, %v457_v60  ;;  %1967 = vmatprep.subr.mxu0 %v1594_v61  ;;  %v579_v5 = vsel %vm576_vm4, %v577_v62, %v578_v63  ;;  %v857_v6 = vsel %vm854_vm5, %v855_v0, %v856_v1  ;;  %v757_v16 = vsel %vm754_vm6, %v755_v14, %v756_v10  ;;  %v1615_v60 = vld [vmem:[%s2890_s5 + $0x1f8] sm:$0xff]  ;;  %v1614_v62 = vld [vmem:[%s2890_s5 + $0x1f0] sm:$0xff]  ;;  %v1613_v0 = vld [vmem:[%s2890_s5 + $0x1e8] sm:$0xff] }
 0x1b6   : > { %1968 = vmatpush3.msra.mxu0 %v1594_v61  ;;  %v1883_v7 = vpop.f32.mrf.mxu0  ;;  %1908 = vmatprep.mubr.msk.f32.mxu1 %vm582_vm3, %v579_v5  ;;  %v1057_v40 = vsel %vm1054_vm7, %v1055_v37, %v1056_v34  ;;  %v1604_v61 = vld [vmem:[%s2890_s5 + $0x1b0] sm:$0xff]  ;;  %v1612_v2 = vld [vmem:[%s2890_s5 + $0x1e0] sm:$0xff]  ;;  %v1649_v14 = vld [vmem:[%s2890_s5 + $0x2e8] sm:$0xff] }
 0x1b7   : > { %1969 = vmatprep.subr.mxu0 %v1593_v3  ;;  %1989 = vmatprep.mubr.msk.f32.mxu0 %vm582_vm3, %v857_v6  ;;  %v580_v9 = vrot.slane %v2514_v4, 1  ;;  %v858_v32 = vrot.slane %v2514_v4, 3  ;;  %v758_v43 = vrot.slane %v2514_v4, 2  ;;  %v1058_v5 = vrot.slane %v2514_v4, 5  ;;  %v1651_v6 = vld [vmem:[%s2890_s5 + $0x2f8] sm:$0xff]  ;;  %v1630_v37 = vld [vmem:[%s2890_s5 + $0x260] sm:$0xff] }
 0x1b8   : > { %1970 = vmatpush3.msra.mxu0 %v1593_v3  ;;  %v1601_v3 = vld [vmem:[%s2890_s5 + $0x198] sm:$0xff]  ;;  %v1256_v7 = vrot.slane %v2497_v58, 7 }
 0x1b9   : > { %1971 = vmatprep.subr.mxu0 %v1592_v8  ;;  %v581_v12 = vsel %vm576_vm4, %v578_v63, %v580_v9  ;;  %v859_v36 = vsel %vm854_vm5, %v856_v1, %v858_v32  ;;  %v759_v47 = vsel %vm754_vm6, %v756_v10, %v758_v43  ;;  %v1603_v63 = vld [vmem:[%s2890_s5 + $0x1a8] sm:$0xff]  ;;  %v1602_v1 = vld [vmem:[%s2890_s5 + $0x1a0] sm:$0xff]  ;;  %v1059_v9 = vsel %vm1054_vm7, %v1056_v34, %v1058_v5  ;;  %v1643_v32 = vld [vmem:[%s2890_s5 + $0x2b8] sm:$0xff] }
 0x1ba   : > { %1972 = vmatpush3.msra.mxu0 %v1592_v8  ;;  %1909 = vmatmul.mubr.msk.f32.vlgmr.msra.gmra.mxu1 %vm582_vm3, %v581_v12  ;;  %v1600_v8 = vld [vmem:[%s2890_s5 + $0x190] sm:$0xff]  ;;  %v1255_v10 = vrot.slane %v2490_v54, 7  ;;  %v1599_v12 = vld [vmem:[%s2890_s5 + $0x188] sm:$0xff] }
 0x1bb   : > { %1939 = vmatpush3.msra.mxu1 %v1581_v51  ;;  %1973 = vmatprep.subr.mxu0 %v1591_v11  ;;  %v957_v51 = vsel %vm954_vm8, %v955_v48, %v956_v45  ;;  %v1642_v34 = vld [vmem:[%s2890_s5 + $0x2b0] sm:$0xff]  ;;  %v1627_v43 = vld [vmem:[%s2890_s5 + $0x248] sm:$0xff] }
 0x1bc   : > { %1940 = vmatprep.subr.mxu1 %v1580_v13  ;;  %1962 = vmatprep.mubr.msk.f32.mxu1 %vm582_vm3, %v757_v16  ;;  %v1598_v16 = vld [vmem:[%s2890_s5 + $0x180] sm:$0xff]  ;;  %v1664_v48 = vld [vmem:[%s2890_s5 + $0x350] sm:$0xff] }
 0x1bd   : > { %1974 = vmatpush3.msra.mxu0 %v1591_v11  ;;  %1941 = vmatpush3.msra.mxu1 %v1580_v13  ;;  %v1650_v11 = vld [vmem:[%s2890_s5 + $0x2f0] sm:$0xff]  ;;  %v1257_v13 = vsel %vm1254_vm9, %v1255_v10, %v1256_v7 }
 0x1be   : > { %1975 = vmatprep.subr.mxu0 %v1590_v18  ;;  %1942 = vmatprep.subr.mxu1 %v1579_v19 }
 0x1bf   : > { %1976 = vmatpush3.msra.mxu0 %v1590_v18  ;;  %1943 = vmatpush3.msra.mxu1 %v1579_v19  ;;  %v958_v18 = vrot.slane %v2514_v4, 4  ;;  %v1648_v19 = vld [vmem:[%s2890_s5 + $0x2e0] sm:$0xff] }
 0x1c0   : > { %1977 = vmatprep.subr.mxu0 %v1589_v20  ;;  %1944 = vmatprep.subr.mxu1 %v1578_v21 }
 0x1c1   : > { %1978 = vmatpush3.msra.mxu0 %v1589_v20  ;;  %1945 = vmatpush3.msra.mxu1 %v1578_v21  ;;  %v1156_v20 = vrot.slane %v2497_v58, 6  ;;  %v1637_v21 = vld [vmem:[%s2890_s5 + $0x298] sm:$0xff] }
 0x1c2   : > { %1979 = vmatprep.subr.mxu0 %v1588_v22  ;;  %1946 = vmatprep.subr.mxu1 %v1577_v23 }
 0x1c3   : > { %1980 = vmatpush3.msra.mxu0 %v1588_v22  ;;  %1947 = vmatpush3.msra.mxu1 %v1577_v23  ;;  %v959_v22 = vsel %vm954_vm8, %v956_v45, %v958_v18  ;;  %v1155_v23 = vrot.slane %v2490_v54, 6  ;;  %v1646_v54 = vld [vmem:[%s2890_s5 + $0x2d0] sm:$0xff]  ;;  %v1158_v45 = vrot.slane %v2514_v4, 6 }
 0x1c4   : > { %1981 = vmatprep.subr.mxu0 %v1587_v24  ;;  %1948 = vmatprep.subr.mxu1 %v1576_v25 }
 0x1c5   : > { %1982 = vmatpush3.msra.mxu0 %v1587_v24  ;;  %1949 = vmatpush3.msra.mxu1 %v1576_v25  ;;  %v1647_v24 = vld [vmem:[%s2890_s5 + $0x2d8] sm:$0xff]  ;;  %v1636_v25 = vld [vmem:[%s2890_s5 + $0x290] sm:$0xff] }
 0x1c6   : > { %1983 = vmatprep.subr.mxu0 %v1586_v26  ;;  %1950 = vmatprep.subr.mxu1 %v1575_v27 }
 0x1c7   : > { %1984 = vmatpush3.msra.mxu0 %v1586_v26  ;;  %1951 = vmatpush3.msra.mxu1 %v1575_v27  ;;  %v1157_v26 = vsel %vm1154_vm10, %v1155_v23, %v1156_v20  ;;  %v1635_v27 = vld [vmem:[%s2890_s5 + $0x288] sm:$0xff] }
 0x1c8   : > { %1985 = vmatprep.subr.mxu0 %v1585_v28  ;;  %1952 = vmatprep.subr.mxu1 %v1574_v29 }
 0x1c9   : > { %1986 = vmatpush3.msra.mxu0 %v1585_v28  ;;  %1953 = vmatpush3.msra.mxu1 %v1574_v29  ;;  %v1645_v28 = vld [vmem:[%s2890_s5 + $0x2c8] sm:$0xff]  ;;  %v1634_v29 = vld [vmem:[%s2890_s5 + $0x280] sm:$0xff] }
 0x1ca   : > { %1987 = vmatprep.subr.mxu0 %v1584_v30  ;;  %1954 = vmatprep.subr.mxu1 %v1573_v31 }
 0x1cb   : > { %1988 = vmatpush3.msra.mxu0 %v1584_v30  ;;  %1955 = vmatpush3.msra.mxu1 %v1573_v31  ;;  %v1644_v30 = vld [vmem:[%s2890_s5 + $0x2c0] sm:$0xff]  ;;  %v1633_v31 = vld [vmem:[%s2890_s5 + $0x278] sm:$0xff] }
 0x1cc   : > { %1990 = vmatmul.mubr.msk.f32.vlgmr.msra.gmra.mxu0 %vm582_vm3, %v859_v36  ;;  %2019 = vmatprep.subr.mxu0 %v1623_v33  ;;  %v1641_v36 = vld [vmem:[%s2890_s5 + $0x2a8] sm:$0xff] }
 0x1cd   : > { %1956 = vmatprep.subr.mxu1 %v1572_v35  ;;  %2020 = vmatpush3.msra.mxu0 %v1623_v33  ;;  %v1632_v33 = vld [vmem:[%s2890_s5 + $0x270] sm:$0xff] }
 0x1ce   : > { %2043 = vmatprep.mubr.msk.f32.mxu0 %vm582_vm3, %v1057_v40  ;;  %1957 = vmatpush3.msra.mxu1 %v1572_v35  ;;  %v1631_v35 = vld [vmem:[%s2890_s5 + $0x268] sm:$0xff]  ;;  %v1258_v40 = vrot.slane %v2514_v4, 7 }
 0x1cf   : > { %2021 = vmatprep.subr.mxu0 %v1622_v38  ;;  %1958 = vmatprep.subr.mxu1 %v1571_v39 }
 0x1d0   : > { %2022 = vmatpush3.msra.mxu0 %v1622_v38  ;;  %1959 = vmatpush3.msra.mxu1 %v1571_v39  ;;  %v1640_v38 = vld [vmem:[%s2890_s5 + $0x2a0] sm:$0xff]  ;;  %v1629_v39 = vld [vmem:[%s2890_s5 + $0x258] sm:$0xff] }
 0x1d1   : > { %2023 = vmatprep.subr.mxu0 %v1621_v41  ;;  %1960 = vmatprep.subr.mxu1 %v1570_v42 }
 0x1d2   : > { %2024 = vmatpush3.msra.mxu0 %v1621_v41  ;;  %1961 = vmatpush3.msra.mxu1 %v1570_v42  ;;  %v1628_v41 = vld [vmem:[%s2890_s5 + $0x250] sm:$0xff]  ;;  %v1259_v42 = vsel %vm1254_vm9, %v1256_v7, %v1258_v40 }
 0x1d3   : > { %2025 = vmatprep.subr.mxu0 %v1620_v44  ;;  %1963 = vmatmul.mubr.msk.f32.vlgmr.msra.gmra.mxu1 %vm582_vm3, %v759_v47  ;;  %v1159_v47 = vsel %vm1154_vm10, %v1156_v20, %v1158_v45 }
 0x1d4   : > { %1992 = vmatprep.subr.mxu1 %v1609_v46  ;;  %2026 = vmatpush3.msra.mxu0 %v1620_v44  ;;  %v1626_v44 = vld [vmem:[%s2890_s5 + $0x240] sm:$0xff] }
 0x1d5   : > { %1993 = vmatpush3.msra.mxu1 %v1609_v46  ;;  %2016 = vmatprep.mubr.msk.f32.mxu1 %vm582_vm3, %v957_v51  ;;  %v1665_v46 = vld [vmem:[%s2890_s5 + $0x358] sm:$0xff] }
 0x1d6   : > { %2027 = vmatprep.subr.mxu0 %v1619_v49  ;;  %1994 = vmatprep.subr.mxu1 %v1608_v50  ;;  %v1661_v51 = vld [vmem:[%s2890_s5 + $0x338] sm:$0xff] }
 0x1d7   : > { %2028 = vmatpush3.msra.mxu0 %v1619_v49  ;;  %1995 = vmatpush3.msra.mxu1 %v1608_v50  ;;  %v1663_v49 = vld [vmem:[%s2890_s5 + $0x348] sm:$0xff]  ;;  %v1662_v50 = vld [vmem:[%s2890_s5 + $0x340] sm:$0xff] }
 0x1d8   : > { %2029 = vmatprep.subr.mxu0 %v1618_v52  ;;  %1996 = vmatprep.subr.mxu1 %v1607_v53 }
 0x1d9   : > { %2030 = vmatpush3.msra.mxu0 %v1618_v52  ;;  %1997 = vmatpush3.msra.mxu1 %v1607_v53  ;;  %v1659_v52 = vld [vmem:[%s2890_s5 + $0x328] sm:$0xff]  ;;  %v1658_v53 = vld [vmem:[%s2890_s5 + $0x320] sm:$0xff] }
 0x1da   : > { %2031 = vmatprep.subr.mxu0 %v1617_v55  ;;  %1998 = vmatprep.subr.mxu1 %v1606_v56 }
 0x1db   : > { %2032 = vmatpush3.msra.mxu0 %v1617_v55  ;;  %1999 = vmatpush3.msra.mxu1 %v1606_v56  ;;  %v1657_v55 = vld [vmem:[%s2890_s5 + $0x318] sm:$0xff]  ;;  %v1656_v56 = vld [vmem:[%s2890_s5 + $0x310] sm:$0xff] }
 0x1dc   : > { %2033 = vmatprep.subr.mxu0 %v1616_v57  ;;  %2000 = vmatprep.subr.mxu1 %v1605_v59 }
 0x1dd   : > { %2034 = vmatpush3.msra.mxu0 %v1616_v57  ;;  %2001 = vmatpush3.msra.mxu1 %v1605_v59  ;;  %v1655_v57 = vld [vmem:[%s2890_s5 + $0x308] sm:$0xff]  ;;  %v1654_v59 = vld [vmem:[%s2890_s5 + $0x300] sm:$0xff] }
 0x1de   : > { %2035 = vmatprep.subr.mxu0 %v1615_v60  ;;  %2002 = vmatprep.subr.mxu1 %v1604_v61 }
 0x1df   : > { %2036 = vmatpush3.msra.mxu0 %v1615_v60  ;;  %2003 = vmatpush3.msra.mxu1 %v1604_v61 }
 0x1e0   : > { %2037 = vmatprep.subr.mxu0 %v1614_v62  ;;  %2004 = vmatprep.subr.mxu1 %v1603_v63 }
 0x1e1   : > { %2038 = vmatpush3.msra.mxu0 %v1614_v62  ;;  %2005 = vmatpush3.msra.mxu1 %v1603_v63 }
 0x1e2   : > { %2039 = vmatprep.subr.mxu0 %v1613_v0  ;;  %2006 = vmatprep.subr.mxu1 %v1602_v1 }
 0x1e3   : > { %2040 = vmatpush3.msra.mxu0 %v1613_v0  ;;  %2007 = vmatpush3.msra.mxu1 %v1602_v1 }
 0x1e4   : > { %2041 = vmatprep.subr.mxu0 %v1612_v2  ;;  %2008 = vmatprep.subr.mxu1 %v1601_v3 }
 0x1e5   : > { %2042 = vmatpush3.msra.mxu0 %v1612_v2  ;;  %2009 = vmatpush3.msra.mxu1 %v1601_v3 }
 0x1e6   : > { %2044 = vmatmul.mubr.msk.f32.vlgmr.msra.gmra.mxu0 %vm582_vm3, %v1059_v9  ;;  %2073 = vmatprep.subr.mxu0 %v1651_v6 }
 0x1e7   : > { %2010 = vmatprep.subr.mxu1 %v1600_v8  ;;  %2074 = vmatpush3.msra.mxu0 %v1651_v6 }
 0x1e8   : > { %2097 = vmatprep.mubr.msk.f32.mxu0 %vm582_vm3, %v1257_v13  ;;  %2011 = vmatpush3.msra.mxu1 %v1600_v8 }
 0x1e9   : > { %2075 = vmatprep.subr.mxu0 %v1650_v11  ;;  %2012 = vmatprep.subr.mxu1 %v1599_v12 }
 0x1ea   : > { %2076 = vmatpush3.msra.mxu0 %v1650_v11  ;;  %2013 = vmatpush3.msra.mxu1 %v1599_v12 }
 0x1eb   : > { %2077 = vmatprep.subr.mxu0 %v1649_v14  ;;  %2014 = vmatprep.subr.mxu1 %v1598_v16 }
 0x1ec   : > { %2078 = vmatpush3.msra.mxu0 %v1649_v14  ;;  %2015 = vmatpush3.msra.mxu1 %v1598_v16 }
 0x1ed   : > { %2079 = vmatprep.subr.mxu0 %v1648_v19  ;;  %2017 = vmatmul.mubr.msk.f32.vlgmr.msra.gmra.mxu1 %vm582_vm3, %v959_v22 }
 0x1ee   : > { %2046 = vmatprep.subr.mxu1 %v1637_v21  ;;  %2080 = vmatpush3.msra.mxu0 %v1648_v19 }
 0x1ef   : > { %2047 = vmatpush3.msra.mxu1 %v1637_v21  ;;  %2070 = vmatprep.mubr.msk.f32.mxu1 %vm582_vm3, %v1157_v26 }
 0x1f0   : > { %2081 = vmatprep.subr.mxu0 %v1647_v24  ;;  %2048 = vmatprep.subr.mxu1 %v1636_v25 }
 0x1f1   : > { %2082 = vmatpush3.msra.mxu0 %v1647_v24  ;;  %2049 = vmatpush3.msra.mxu1 %v1636_v25 }
 0x1f2   : > { %2083 = vmatprep.subr.mxu0 %v1646_v54  ;;  %2050 = vmatprep.subr.mxu1 %v1635_v27 }
 0x1f3   : > { %2084 = vmatpush3.msra.mxu0 %v1646_v54  ;;  %2051 = vmatpush3.msra.mxu1 %v1635_v27  ;;  %v1668_v27 = vld [vmem:[%s2891_s6] ss:$0 sm:$0xff] }
 0x1f4   : > { %2085 = vmatprep.subr.mxu0 %v1645_v28  ;;  %2052 = vmatprep.subr.mxu1 %v1634_v29 }
 0x1f5   : > { %2086 = vmatpush3.msra.mxu0 %v1645_v28  ;;  %2053 = vmatpush3.msra.mxu1 %v1634_v29 }
 0x1f6   : > { %2087 = vmatprep.subr.mxu0 %v1644_v30  ;;  %2054 = vmatprep.subr.mxu1 %v1633_v31 }
 0x1f7   : > { %2088 = vmatpush3.msra.mxu0 %v1644_v30  ;;  %2055 = vmatpush3.msra.mxu1 %v1633_v31 }
 0x1f8   : > { %2089 = vmatprep.subr.mxu0 %v1643_v32  ;;  %2056 = vmatprep.subr.mxu1 %v1632_v33 }
 0x1f9   : > { %2090 = vmatpush3.msra.mxu0 %v1643_v32  ;;  %2057 = vmatpush3.msra.mxu1 %v1632_v33 }
 0x1fa   : > { %2091 = vmatprep.subr.mxu0 %v1642_v34  ;;  %2058 = vmatprep.subr.mxu1 %v1631_v35 }
 0x1fb   : > { %2092 = vmatpush3.msra.mxu0 %v1642_v34  ;;  %2059 = vmatpush3.msra.mxu1 %v1631_v35 }
 0x1fc   : > { %2093 = vmatprep.subr.mxu0 %v1641_v36  ;;  %2060 = vmatprep.subr.mxu1 %v1630_v37 }
 0x1fd   : > { %2094 = vmatpush3.msra.mxu0 %v1641_v36  ;;  %2061 = vmatpush3.msra.mxu1 %v1630_v37 }
 0x1fe   : > { %2095 = vmatprep.subr.mxu0 %v1640_v38  ;;  %2062 = vmatprep.subr.mxu1 %v1629_v39 }
 0x1ff   : > { %2096 = vmatpush3.msra.mxu0 %v1640_v38  ;;  %2063 = vmatpush3.msra.mxu1 %v1629_v39 }
 0x200   : > { %2098 = vmatmul.mubr.msk.f32.vlgmr.msra.gmra.mxu0 %vm582_vm3, %v1259_v42  ;;  %2064 = vmatprep.subr.mxu1 %v1628_v41 }
 0x201   : > { %2065 = vmatpush3.msra.mxu1 %v1628_v41 }
 0x202   : > { %2066 = vmatprep.subr.mxu1 %v1627_v43 }
 0x203   : > { %2067 = vmatpush3.msra.mxu1 %v1627_v43 }
 0x204   : > { %2068 = vmatprep.subr.mxu1 %v1626_v44 }
 0x205   : > { %2069 = vmatpush3.msra.mxu1 %v1626_v44 }
 0x206   : > { %2071 = vmatmul.mubr.msk.f32.vlgmr.msra.gmra.mxu1 %vm582_vm3, %v1159_v47  ;;  %2100 = vmatprep.subr.mxu1 %v1665_v46 }
 0x207   : > { %2101 = vmatpush3.msra.mxu1 %v1665_v46  ;;  %2124 = vmatprep.mubr.msk.f32.mxu1 %vm582_vm3, %v2497_v58  ;;  %v1660_v58 = vld [vmem:[%s2890_s5 + $0x330] sm:$0xff] }
 0x208   : > { %2102 = vmatprep.subr.mxu1 %v1664_v48 }
 0x209   : > { %2103 = vmatpush3.msra.mxu1 %v1664_v48 }
 0x20a   : > { %2104 = vmatprep.subr.mxu1 %v1663_v49 }
 0x20b   : > { %2105 = vmatpush3.msra.mxu1 %v1663_v49 }
 0x20c   : > { %2106 = vmatprep.subr.mxu1 %v1662_v50 }
 0x20d   : > { %2107 = vmatpush3.msra.mxu1 %v1662_v50 }
 0x20e   : > { %2108 = vmatprep.subr.mxu1 %v1661_v51 }
 0x20f   : > { %2109 = vmatpush3.msra.mxu1 %v1661_v51 }
 0x210   : > { %2110 = vmatprep.subr.mxu1 %v1660_v58 }
 0x211   : > { %2111 = vmatpush3.msra.mxu1 %v1660_v58 }
 0x212   : > { %2112 = vmatprep.subr.mxu1 %v1659_v52 }
 0x213   : > { %2113 = vmatpush3.msra.mxu1 %v1659_v52 }
 0x214   : > { %2114 = vmatprep.subr.mxu1 %v1658_v53 }
 0x215   : > { %2115 = vmatpush3.msra.mxu1 %v1658_v53 }
 0x216   : > { %2116 = vmatprep.subr.mxu1 %v1657_v55 }
 0x217   : > { %2117 = vmatpush3.msra.mxu1 %v1657_v55 }
 0x218   : > { %2118 = vmatprep.subr.mxu1 %v1656_v56 }
 0x219   : > { %2119 = vmatpush3.msra.mxu1 %v1656_v56 }
 0x21a   : > { %2120 = vmatprep.subr.mxu1 %v1655_v57 }
 0x21b   : > { %2121 = vmatpush3.msra.mxu1 %v1655_v57 }
 0x21c   : > { %2122 = vmatprep.subr.mxu1 %v1654_v59 }
 0x21d   : > { %2123 = vmatpush3.msra.mxu1 %v1654_v59 }
 0x21e   : > { %2125 = vmatmul.mubr.msk.f32.vlgmr.msra.gmra.mxu1 %vm582_vm3, %v2514_v4 }
 0x273   : > { %v1937_v62 = vpop.f32.mrf.mxu0 }
 0x275   : > { %v732_v1 = vpop.f32.mrf.mxu0 }
 0x27a   : > { %v1910_v60 = vpop.f32.mrf.mxu1 }
 0x27b   : > { %v738_v0 = vadd.f32 %v1937_v62, %v1910_v60 }
 0x27c   : > { %v653_v61 = vpop.f32.mrf.mxu1 }
 0x27d   : > { %v733_v3 = vadd.f32 %v732_v1, %v653_v61 }
 0x28c   : > { %v1991_v6 = vpop.f32.mrf.mxu0 }
 0x28e   : > { %v930_v10 = vpop.f32.mrf.mxu0 }
 0x293   : > { %v1964_v63 = vpop.f32.mrf.mxu1 }
 0x294   : > { %v840_v5 = vadd.f32 %v1964_v63, %v738_v0 }
 0x295   : > { %v830_v2 = vpop.f32.mrf.mxu1 }
 0x296   : > { %v839_v8 = vadd.f32 %v830_v2, %v733_v3  ;;  %v940_v9 = vadd.f32 %v1991_v6, %v840_v5 }
 0x298   : > { %v939_v13 = vadd.f32 %v930_v10, %v839_v8 }
 0x2a6   : > { %v2045_v14 = vpop.f32.mrf.mxu0 }
 0x2a8   : > { %v1130_v19 = vpop.f32.mrf.mxu0 }
 0x2ad   : > { %v2018_v7 = vpop.f32.mrf.mxu1 }
 0x2ae   : > { %v1040_v12 = vadd.f32 %v2018_v7, %v940_v9 }
 0x2af   : > { %v1030_v11 = vpop.f32.mrf.mxu1 }
 0x2b0   : > { %v1039_v4 = vadd.f32 %v1030_v11, %v939_v13  ;;  %v1140_v18 = vadd.f32 %v2045_v14, %v1040_v12 }
 0x2b2   : > { %v1139_v22 = vadd.f32 %v1130_v19, %v1039_v4 }
 0x2c0   : > { %v2099_v23 = vpop.f32.mrf.mxu0 }
 0x2c2   : > { %v1330_v26 = vpop.f32.mrf.mxu0 }
 0x2c6   : > { %v2072_v16 = vpop.f32.mrf.mxu1 }
 0x2c7   : > { %v1240_v21 = vadd.f32 %v2072_v16, %v1140_v18 }
 0x2c8   : > { %v1230_v20 = vpop.f32.mrf.mxu1 }
 0x2c9   : > { %v1239_v24 = vadd.f32 %v1230_v20, %v1139_v22  ;;  %v1340_v25 = vadd.f32 %v2099_v23, %v1240_v21 }
 0x2cb   : > { %v1339_v29 = vadd.f32 %v1330_v26, %v1239_v24 }
 0x2de   : > { %v2126_v54 = vpop.f32.mrf.mxu1 }
 0x2df   : > { %v1432_v28 = vadd.f32 %v2126_v54, %v1340_v25 }
 0x2e0   : > { %v1422_v30 = vpop.f32.mrf.mxu1 }
 0x2e1   : > { %v1441_v31 = vadd.f32 %v1668_v27, %v1432_v28  ;;  %v1431_v32 = vadd.f32 %v1422_v30, %v1339_v29 }
 0x2e3   : > { %v1443_v33 = vadd.f32 %v1441_v31, %v2384_v17  ;;  %v1440_v34 = vadd.f32 %v1668_v27, %v1431_v32 }
 0x2e5   : > { %v1447_v35 = vmul.f32 0.044715, %v1443_v33  ;;  %v1442_v36 = vadd.f32 %v1440_v34, %v2379_v15  ;;  %v1445_v17 = vmul.f32 0.5, %v1443_v33 }
 0x2e7   : > { %v1449_v37 = vmul.f32 %v1447_v35, %v1443_v33  ;;  %v1446_v38 = vmul.f32 0.044715, %v1442_v36  ;;  %v1444_v48 = vmul.f32 0.5, %v1442_v36 }
 0x2e9   : > { %v1451_v39 = vmul.f32 %v1449_v37, %v1443_v33  ;;  %v1448_v40 = vmul.f32 %v1446_v38, %v1442_v36 }
 0x2eb   : > { %v1453_v41 = vadd.f32 %v1451_v39, %v1443_v33  ;;  %v1450_v42 = vmul.f32 %v1448_v40, %v1442_v36 }
 0x2ed   : > { %v1455_v43 = vmul.f32 0.7978846, %v1453_v41  ;;  %v1452_v44 = vadd.f32 %v1450_v42, %v1442_v36 }
 0x2ef   : > { %2170 = vtanh.f32 %v1455_v43  ;;  %v1454_v45 = vmul.f32 0.7978846, %v1452_v44 }
 0x2f1   : > { %2172 = vtanh.f32 %v1454_v45 }
 0x2fc   : > { %v2171_v46 = vpop.eup %2170 }
 0x2fd   : > { %v1459_v47 = vadd.f32 1.0, %v2171_v46 }
 0x2fe   : > { %v2173_v15 = vpop.eup %2172 }
 0x2ff   : > { %v1458_v49 = vadd.f32 1.0, %v2173_v15  ;;  %v1461_v50 = vmul.f32 %v1459_v47, %v1445_v17 }
 0x301   : > { %v1460_v51 = vmul.f32 %v1458_v49, %v1444_v48  ;;  %1463 = vst.msk [vmem:[%s271_s17 + $0x8] sm:$0xff] %vm287_vm0, %v1461_v50 }
 0x303   : > { %1462 = vst.msk [vmem:[%s271_s17] sm:$0xff] %vm287_vm0, %v1460_v51 }
 0x304   : > { %2187 = shalt.err (!%p2184_p3)
}
 0x305   : > { %s2188_s13 = scalar_lea.hbm %s2839_s21, 256  ;;  %s2192_s15 = scalar_lea.hbm %s2892_s7, 512 }
 0x306   : > { %p2189_p4 = scmp.ne.s32.totalorder %s2839_s21, %s2188_s13  ;;  %p2193_p9 = scmp.lt.s32.totalorder %s2839_s21, %s2892_s7 }
 0x307   : > { %p2194_p10 = scmp.lt.s32.totalorder %s2192_s15, %s2188_s13 }
 0x308   : > { %p2190_p7 = pnand %p2189_p4, %p2319_p5 }
 0x309   : > { %p2195_p11 = por %p2194_p10, %p2193_p9 }
 0x30a   : > { %p2191_p8 = pneg %p2190_p7 }
 0x30c   : > { %p2196_p12 = pnand %p2195_p11, %p2191_p8 }
 0x30e   : > { %2199 = shalt.err (!%p2196_p12)
}
 0x30f   : > { %s2239_s19 = smov 128   ;;  %s2240_s20 = smov 8  }
 0x310   : > { %2127 = dma.vmem_to_hbm [thread:$0]  (%p2319_p5), %s2841_s18, 256, %s2839_s21, %s2845_s28, %s2239_s19, %s2239_s19, %s2240_s20  }
 0x311 PF: > { %p2133_p13 = scmp.ge.s32.totalorder %s2234_s27, 2  ;;  %s1493_s22 = sand.u32 1, %s2222_s24  }
 0x312   : > { %s1494_s23 = scalar_lea.sflag [#allocation3], %s1493_s22 }
 0x313   : > { %p2130_p0 = pnand %p2133_p13, %p2323_p6 }
 0x315   : > { %p2131_p1 = pneg %p2130_p0 }
 0x317   : > { %2217 = dma.done.wait (%p2131_p1), %s1494_s23, 256  }
 0x318   : > { %2219 = vsyncadd (%p2131_p1), %s1494_s23, 4294967040  ;;  %p17_p2 = scmp.ge.s32.totalorder %s2306_s30, 4   ;;  %s2895_s24 = smov %s2226_s25 }
 0x319   : > { %s2896_s25 = smov %s2230_s26  ;;  %s2897_s26 = smov %s2317_s10 }
 0x31a   : > { %s2898_s27 = smov %s2306_s30  ;;  %19 = sbr.rel (!%p17_p2) target bundleno = 3 (0x3), region = 91 }
 0x31f   :  { %1499 = vsyncpa [#allocation3], 1 }
 0x320   :  { %1501 = vsyncpa [#allocation3 + $0x1], 1 }

</bundles_post_ra>
